<compile_context>
chip_gen: v7x
topology: tpu7x:2x2x1
jax: 0.10.0
libtpu: 0.0.40
codegen_flags: <defaults>
</compile_context>

<pallas_src>
import functools

import jax
import jax.numpy as jnp
import numpy as np
from jax import lax
from jax.experimental import pallas as pl
from jax.experimental.pallas import tpu as pltpu

_F32_NEG_SENTINEL = float(jnp.finfo(jnp.float32).min)


def _xent_kernel(logits_ref, picked_ref, tgt_ref, loss_ref, m_acc, l_acc, *,
                 pad_idx: int, mask_pad: bool, num_class_tiles: int,
                 tail_size: int, tile_c: int):
    """Online-logsumexp cross entropy over a (token-tile, class-tile) grid."""
    k = pl.program_id(1)                        # class-tile index (reduction axis, last)

    @pl.when(k == 0)
    def _init():
        # Finite sentinel (not -inf): alpha = exp(m_prev - m_new) can never be NaN.
        m_acc[...] = jnp.full(m_acc.shape, _F32_NEG_SENTINEL, jnp.float32)
        l_acc[...] = jnp.zeros(l_acc.shape, jnp.float32)

    x = logits_ref[...]                         # (tile_n, tile_c), native dtype

    def update(xm):
        m_prev = m_acc[...]
        # Row max in the input dtype (exact; bf16 keeps VPU lanes packed on v6e/v7x).
        m_tile = jnp.max(xm, axis=-1, keepdims=True).astype(jnp.float32)
        m_new = jnp.maximum(m_prev, m_tile)
        alpha = jnp.exp(m_prev - m_new)         # argument <= 0 always -> no overflow
        e = jnp.exp(xm.astype(jnp.float32) - m_new)
        l_acc[...] = alpha * l_acc[...] + jnp.sum(e, axis=-1, keepdims=True)
        m_acc[...] = m_new

    if tail_size != tile_c:                     # static: C % tile_c != 0
        # Only the last class tile pays the tail-masking compare/select.
        @pl.when(k != num_class_tiles - 1)
        def _full():
            update(x)

        @pl.when(k == num_class_tiles - 1)
        def _tail():
            lane = lax.broadcasted_iota(jnp.int32, (1, tile_c), 1)
            xm = jnp.where(lane < tail_size, x, jnp.array(-jnp.inf, dtype=x.dtype))
            update(xm)
    else:
        update(x)

    @pl.when(k == num_class_tiles - 1)
    def _finalize():
        loss = m_acc[...] + jnp.log(l_acc[...]) - picked_ref[...]
        if mask_pad:
            loss = jnp.where(tgt_ref[...] == pad_idx, jnp.float32(0.0), loss)
        loss_ref[...] = loss


def _vmem_limit_bytes() -> int:
    """VMEM budget: ~3/4 of physical capacity, capped at 100 MiB.

    -> ~96 MiB on 128-MiB parts (v5e/v6e), ~48 MiB on 64-MiB parts (v7x).
    """
    try:
        cap = int(pltpu.get_tpu_info().vmem_capacity_bytes)
    except Exception:
        cap = 64 * 1024 * 1024          # conservative fallback (v7x-sized)
    return int(min(cap * 3 // 4, 100 * 1024 * 1024))


def _choose_tiles(n, c, itemsize, tile_n, tile_c, vmem_limit):
    # Sublane packing granularity: 8 rows for 4-byte dtypes, 16 for 2-byte.
    row_align = 16 if itemsize == 2 else 8
    if tile_n is None:
        if n <= row_align:
            tile_n = n
        else:
            # Guarantee >= 2 token tiles whenever possible so the "parallel"
            # token axis can shard across both v7x TensorCores.
            half = -(-n // 2)
            half = -(-half // row_align) * row_align
            tile_n = min(256, half)
    if tile_c is None:
        # Per-element VMEM: double-buffered input tile + f32 temporaries
        # (upcast x, exp(x - m), slack for the tail mask / where).
        per_elem = 2 * itemsize + 16
        budget = max(vmem_limit - (2 << 20), 4 << 20)
        max_c = budget // (per_elem * tile_n)
        if c <= max_c:
            tile_c = c
        else:
            tile_c = max(128, min(8192, (max_c // 128) * 128))
    # Mosaic block legality: last two block dims divisible by (row_align, 128)
    # or equal to the full array dims.
    assert tile_n == n or tile_n % row_align == 0, (tile_n, n)
    assert tile_c == c or tile_c % 128 == 0, (tile_c, c)
    return tile_n, tile_c


def cross_entropy(logits, targets, pad_idx: int, mask_pad: bool = True, *,
                  tile_n=None, tile_c=None):
    """Per-token cross-entropy (reduction='none'); padding positions set to 0."""
    N, C = logits.shape
    assert targets.shape[0] == N
    itemsize = jnp.dtype(logits.dtype).itemsize
    vmem_limit = _vmem_limit_bytes()
    tile_n, tile_c = _choose_tiles(N, C, itemsize, tile_n, tile_c, vmem_limit)

    targets_2d = targets.astype(jnp.int32).reshape(N, 1)
    # Target-logit gather hoisted out of the class-tile loop: a tiny N-element
    # XLA gather; streamed into the kernel as a k-invariant (tile_n, 1) input.
    picked = jnp.take_along_axis(logits, targets_2d, axis=-1).astype(jnp.float32)

    num_token_tiles = pl.cdiv(N, tile_n)
    num_class_tiles = pl.cdiv(C, tile_c)
    tail_size = C - (num_class_tiles - 1) * tile_c   # static size of last class tile
    grid = (num_token_tiles, num_class_tiles)        # reduction axis last

    kernel = functools.partial(
        _xent_kernel, pad_idx=pad_idx, mask_pad=mask_pad,
        num_class_tiles=num_class_tiles, tail_size=tail_size, tile_c=tile_c)

    cost = pl.CostEstimate(
        flops=4 * N * C,                 # max, sub, sum-exp accumulate, scale
        transcendentals=N * C + N,       # exp over logits + final log
        bytes_accessed=N * C * itemsize + 3 * N * 4,
    )

    out = pl.pallas_call(
        kernel,
        out_shape=jax.ShapeDtypeStruct((N, 1), jnp.float32),
        grid_spec=pltpu.PrefetchScalarGridSpec(
            num_scalar_prefetch=0,
            grid=grid,
            in_specs=[
                pl.BlockSpec((tile_n, tile_c), lambda i, k: (i, k)),  # logits tile
                pl.BlockSpec((tile_n, 1), lambda i, k: (i, 0)),       # picked logit (k-invariant)
                pl.BlockSpec((tile_n, 1), lambda i, k: (i, 0)),       # targets (k-invariant)
            ],
            out_specs=pl.BlockSpec((tile_n, 1), lambda i, k: (i, 0)),
            scratch_shapes=[
                pltpu.VMEM((tile_n, 1), jnp.float32),   # running max
                pltpu.VMEM((tile_n, 1), jnp.float32),   # running sum-exp
            ],
        ),
        compiler_params=pltpu.CompilerParams(
            dimension_semantics=("parallel", "arbitrary"),
            vmem_limit_bytes=int(vmem_limit),
        ),
        cost_estimate=cost,
    )(logits, picked, targets_2d)

    return out.reshape(N)


def _reference(logits, targets, pad_idx, mask_pad=True):
    logp = jax.nn.log_softmax(logits.astype(jnp.float32), axis=-1)
    per_tok = -jnp.take_along_axis(logp, targets[:, None].astype(jnp.int32), axis=-1)[:, 0]
    if mask_pad:
        per_tok = jnp.where(targets == pad_idx, 0.0, per_tok)
    return per_tok


if __name__ == "__main__":
    key = jax.random.PRNGKey(0)
    PAD_IDX = 0

    def check(logits, targets, mask_pad, **tiles):
        out = cross_entropy(logits, targets, PAD_IDX, mask_pad, **tiles)
        out = jax.block_until_ready(out)
        ref = _reference(logits, targets, PAD_IDX, mask_pad)
        np.testing.assert_allclose(np.asarray(out), np.asarray(ref),
                                   rtol=2e-5, atol=2e-5)

    k1, k2, k3, k4, k5, k6 = jax.random.split(key, 6)

    # Case 1: batch=8 x seq=8 tokens, vocab=384, f32; force class-axis tiling
    # (3 class tiles, no tail).
    logits1 = jax.random.normal(k1, (64, 384), jnp.float32)
    targets1 = jax.random.randint(k2, (64,), 0, 384, jnp.int32)
    targets1 = targets1.at[3].set(PAD_IDX).at[17].set(PAD_IDX)
    check(logits1, targets1, True, tile_n=32, tile_c=128)

    # Case 2: ragged token count (48) and non-multiple-of-128 vocab (200):
    # exercises the partial last token tile and last-class-tile-only masking.
    logits2 = jax.random.normal(k3, (48, 200), jnp.float32)
    targets2 = jax.random.randint(k4, (48,), 0, 200, jnp.int32)
    targets2 = targets2.at[0].set(PAD_IDX).at[11].set(PAD_IDX)
    check(logits2, targets2, True, tile_n=32, tile_c=128)

    # Case 3: bf16 logits streamed as bf16 (bf16 row-max, f32 exp/accumulate),
    # default VMEM-derived tile selection, mask_pad=False path.
    logits3 = jax.random.normal(k5, (64, 512), jnp.float32).astype(jnp.bfloat16)
    targets3 = jax.random.randint(k6, (64,), 0, 512, jnp.int32)
    check(logits3, targets3, False)

    print("KERNEL_OK")
</pallas_src>

<mosaic_0001>
module attributes {stable_mosaic.version = 11 : i64} {
  func.func @_xent_kernel(%arg0: i32, %arg1: i32, %arg2: memref<32x128xf32, #tpu.memory_space<vmem>>, %arg3: memref<32x1xf32, #tpu.memory_space<vmem>>, %arg4: memref<32x1xi32, #tpu.memory_space<vmem>>, %arg5: memref<32x1xf32, #tpu.memory_space<vmem>>, %arg6: memref<32x1xf32, #tpu.memory_space<vmem>>, %arg7: memref<32x1xf32, #tpu.memory_space<vmem>>) attributes {dimension_semantics = [#tpu.dimension_semantics<parallel>, #tpu.dimension_semantics<arbitrary>], iteration_bounds = array<i64: 2, 3>, scalar_prefetch = 0 : i64, scratch_operands = 2 : i64, tpu.core_type = #tpu.core_type<tc>, window_params = [{transform_indices = @transform_0, window_bounds = array<i64: 32, 128>}, {transform_indices = @transform_1, window_bounds = array<i64: 32, 1>}, {transform_indices = @transform_2, window_bounds = array<i64: 32, 1>}, {transform_indices = @transform_3, window_bounds = array<i64: 32, 1>}]} {
    %c0_i32 = arith.constant 0 : i32
    %0 = arith.cmpi eq, %arg1, %c0_i32 : i32
    %1 = arith.extui %0 : i1 to i32
    %c0_i32_0 = arith.constant 0 : i32
    %2 = arith.cmpi ne, %1, %c0_i32_0 : i32
    scf.if %2 {
      %cst_12 = arith.constant -3.40282347E+38 : f32
      %23 = vector.broadcast %cst_12 : f32 to vector<32x1xf32>
      %c0_13 = arith.constant 0 : index
      %c0_14 = arith.constant 0 : index
      %24 = vector.load %arg6[%c0_13, %c0_14] : memref<32x1xf32, #tpu.memory_space<vmem>>, vector<32x1xf32>
      tpu.vector_store %arg6[%c0_13, %c0_14], %23 {strides = array<i32>} : memref<32x1xf32, #tpu.memory_space<vmem>>, vector<32x1xf32>,
      %cst_15 = arith.constant 0.000000e+00 : f32
      %25 = vector.broadcast %cst_15 : f32 to vector<32x1xf32>
      %c0_16 = arith.constant 0 : index
      %c0_17 = arith.constant 0 : index
      %26 = vector.load %arg7[%c0_16, %c0_17] : memref<32x1xf32, #tpu.memory_space<vmem>>, vector<32x1xf32>
      tpu.vector_store %arg7[%c0_16, %c0_17], %25 {strides = array<i32>} : memref<32x1xf32, #tpu.memory_space<vmem>>, vector<32x1xf32>,
    } else {
    }
    %c0 = arith.constant 0 : index
    %c0_1 = arith.constant 0 : index
    %3 = vector.load %arg2[%c0, %c0_1] : memref<32x128xf32, #tpu.memory_space<vmem>>, vector<32x128xf32>
    %c0_2 = arith.constant 0 : index
    %c0_3 = arith.constant 0 : index
    %4 = vector.load %arg6[%c0_2, %c0_3] : memref<32x1xf32, #tpu.memory_space<vmem>>, vector<32x1xf32>
    %cst = arith.constant dense<0xFF800000> : vector<32xf32>
    %5 = vector.multi_reduction <maximumf>, %3, %cst [1] : vector<32x128xf32> to vector<32xf32>
    %6 = vector.shape_cast %5 : vector<32xf32> to vector<32x1xf32>
    %7 = arith.maximumf %4, %6 : vector<32x1xf32>
    %8 = arith.subf %4, %7 : vector<32x1xf32>
    %9 = math.exp %8 : vector<32x1xf32>
    %10 = vector.broadcast %7 : vector<32x1xf32> to vector<32x128xf32>
    %11 = arith.subf %3, %10 : vector<32x128xf32>
    %12 = math.exp %11 : vector<32x128xf32>
    %c0_4 = arith.constant 0 : index
    %c0_5 = arith.constant 0 : index
    %13 = vector.load %arg7[%c0_4, %c0_5] : memref<32x1xf32, #tpu.memory_space<vmem>>, vector<32x1xf32>
    %14 = arith.mulf %9, %13 : vector<32x1xf32>
    %cst_6 = arith.constant dense<0.000000e+00> : vector<32xf32>
    %15 = vector.multi_reduction <add>, %12, %cst_6 [1] : vector<32x128xf32> to vector<32xf32>
    %16 = vector.shape_cast %15 : vector<32xf32> to vector<32x1xf32>
    %17 = arith.addf %14, %16 : vector<32x1xf32>
    %c0_7 = arith.constant 0 : index
    %c0_8 = arith.constant 0 : index
    %18 = vector.load %arg7[%c0_7, %c0_8] : memref<32x1xf32, #tpu.memory_space<vmem>>, vector<32x1xf32>
    tpu.vector_store %arg7[%c0_7, %c0_8], %17 {strides = array<i32>} : memref<32x1xf32, #tpu.memory_space<vmem>>, vector<32x1xf32>,
    %c0_9 = arith.constant 0 : index
    %c0_10 = arith.constant 0 : index
    %19 = vector.load %arg6[%c0_9, %c0_10] : memref<32x1xf32, #tpu.memory_space<vmem>>, vector<32x1xf32>
    tpu.vector_store %arg6[%c0_9, %c0_10], %7 {strides = array<i32>} : memref<32x1xf32, #tpu.memory_space<vmem>>, vector<32x1xf32>,
    %c2_i32 = arith.constant 2 : i32
    %20 = arith.cmpi eq, %arg1, %c2_i32 : i32
    %21 = arith.extui %20 : i1 to i32
    %c0_i32_11 = arith.constant 0 : i32
    %22 = arith.cmpi ne, %21, %c0_i32_11 : i32
    scf.if %22 {
      %c0_12 = arith.constant 0 : index
      %c0_13 = arith.constant 0 : index
      %23 = vector.load %arg6[%c0_12, %c0_13] : memref<32x1xf32, #tpu.memory_space<vmem>>, vector<32x1xf32>
      %c0_14 = arith.constant 0 : index
      %c0_15 = arith.constant 0 : index
      %24 = vector.load %arg7[%c0_14, %c0_15] : memref<32x1xf32, #tpu.memory_space<vmem>>, vector<32x1xf32>
      %25 = math.log %24 : vector<32x1xf32>
      %26 = arith.addf %23, %25 : vector<32x1xf32>
      %c0_16 = arith.constant 0 : index
      %c0_17 = arith.constant 0 : index
      %27 = vector.load %arg3[%c0_16, %c0_17] : memref<32x1xf32, #tpu.memory_space<vmem>>, vector<32x1xf32>
      %28 = arith.subf %26, %27 : vector<32x1xf32>
      %c0_18 = arith.constant 0 : index
      %c0_19 = arith.constant 0 : index
      %29 = vector.load %arg4[%c0_18, %c0_19] : memref<32x1xi32, #tpu.memory_space<vmem>>, vector<32x1xi32>
      %c0_i32_20 = arith.constant 0 : i32
      %30 = vector.broadcast %c0_i32_20 : i32 to vector<32x1xi32>
      %31 = arith.cmpi eq, %29, %30 : vector<32x1xi32>
      %cst_21 = arith.constant 0.000000e+00 : f32
      %32 = vector.broadcast %cst_21 : f32 to vector<32x1xf32>
      %33 = arith.select %31, %32, %28 : vector<32x1xi1>, vector<32x1xf32>
      %c0_22 = arith.constant 0 : index
      %c0_23 = arith.constant 0 : index
      %34 = vector.load %arg5[%c0_22, %c0_23] : memref<32x1xf32, #tpu.memory_space<vmem>>, vector<32x1xf32>
      tpu.vector_store %arg5[%c0_22, %c0_23], %33 {strides = array<i32>} : memref<32x1xf32, #tpu.memory_space<vmem>>, vector<32x1xf32>,
    } else {
    }
    return
  }
  func.func @transform_0(%arg0: i32, %arg1: i32) -> (i32, i32) {
    %c0_i32 = arith.constant 0 : i32
    return %arg0, %arg1 : i32, i32
  }
  func.func @transform_1(%arg0: i32, %arg1: i32) -> (i32, i32) {
    %c0_i32 = arith.constant 0 : i32
    %c0_i32_0 = arith.constant 0 : i32
    return %arg0, %c0_i32 : i32, i32
  }
  func.func @transform_2(%arg0: i32, %arg1: i32) -> (i32, i32) {
    %c0_i32 = arith.constant 0 : i32
    %c0_i32_0 = arith.constant 0 : i32
    return %arg0, %c0_i32 : i32, i32
  }
  func.func @transform_3(%arg0: i32, %arg1: i32) -> (i32, i32) {
    %c0_i32 = arith.constant 0 : i32
    %c0_i32_0 = arith.constant 0 : i32
    return %arg0, %c0_i32 : i32, i32
  }
}

</mosaic_0001>

<bundles_post_ra>
// kernel: tpu_custom_call.1
= control target key start
LH: loop header
LB: loop body
LE: loop exit
PB: predicated region body
PF: predicated region fallthrough
CT: control target
= control target key end

     0   :  { %8 = vsyncpa [#allocation5], 0  ;;  %s949_s0 = inlined_call_operand.hbm [shape: f32[64,384], index: 0, kind: input, shape index: {}]   ;;  %s950_s1 = inlined_call_operand.vmem [shape: f32[64,1], index: 1, kind: input, shape index: {}]   ;;  %s951_s2 = inlined_call_operand.vmem [shape: s32[64,1], index: 2, kind: input, shape index: {}]   ;;  %s952_s3 = inlined_call_operand.vmem [shape: f32[64,1], index: 3, kind: output, shape index: {}]  }
   0x1   :  { %10 = vsyncpa [#allocation5 + $0x1], 0  ;;  %s761_s12 = smov 0   ;;  %s763_s13 = smov 0  }
   0x2   :  { %s765_s14 = smov 0   ;;  %s767_s15 = smov 0  }
   0x3   :  { %s769_s16 = smov 0   ;;  %s771_s17 = smov 0  }
   0x4   :  { %s773_s18 = smov 0   ;;  %s775_s19 = smov 0  }
   0x5 LB: > { %s512_s20 = sadd.s32 4294967295, %s732_s19   ;;  %s25_s21 = sadd.s32 1, %s724_s17  ;;  %s732_s19 = sphi %s775_s19, %s16_s19   ;;  %s728_s18 = sphi %s773_s18, %s963_s18   ;;  %s724_s17 = sphi %s771_s17, %s962_s17   ;;  %s720_s16 = sphi %s769_s16, %s961_s16   ;;  %s716_s15 = sphi %s767_s15, %s960_s15   ;;  %s712_s14 = sphi %s765_s14, %s959_s14   ;;  %s708_s13 = sphi %s763_s13, %s958_s13   ;;  %s704_s12 = sphi %s761_s12, %s957_s12  }
   0x6   : > { %p26_p0 = scmp.ge.s32.totalorder %s25_s21, 3  ;;  %s28_s22 = sadd.s32 1, %s728_s18 }
   0x7   : > { %s37_s23 = sadd.s32 1, %s712_s14  ;;  %p44_p1 = scmp.ne.s32.totalorder %s712_s14, %s708_s13 }
   0x8   : > { %s965_s21 = smov (%p26_p0, %s25_s21), 0  ;;  %s967_s22 = smov (!%p26_p0, %s28_s22), %s728_s18 }
   0x9   : > { %s33_s24 = ssub.s32 %s724_s17, %s965_s21  ;;  %p45_p2 = scmp.eq.s32.totalorder %s732_s19, 0 }
   0xa   : > { %p30_p3 = scmp.ge.s32.totalorder %s967_s22, 2  ;;  %p50_p4 = scmp.ne.s32.totalorder %s708_s13, %s704_s12 }
   0xb   : > { %p812_p5 = por %p45_p2, %p44_p1  ;;  %p51_p6 = scmp.eq.s32.totalorder %s512_s20, 0 }
   0xc   : > { %s969_s22 = smov (%p30_p3, %s967_s22), 0  ;;  %p539_p8 = scmp.lt.s32.totalorder %s732_s19, 6 }
   0xd   : > { %p818_p7 = por %p51_p6, %p50_p4  ;;  %s32_s27 = ssub.s32 %s728_s18, %s969_s22 }
   0xe   : > { %s34_s28 = sor.u32 %s33_s24, %s32_s27  ;;  %s152_s29 = sand.u32 1, %s712_s14  }
   0xf   : > { %p35_p9 = scmp.eq.s32.totalorder %s34_s28, 0  ;;  %s516_s30 = sshll.u32 %s152_s29, 5 }
  0x10   : > { %s532_s4 = smul.u32 12, %s728_s18  ;;  %s156_s8 = scalar_lea.vmem [#allocation4], %s516_s30 }
  0x11   : > { %s828_s5 = scalar_select %p35_p9, %s712_s14, %s37_s23  }
  0x12   : > { %s162_s6 = sadd.s32 %s724_s17, %s532_s4  ;;  %s165_s9 = sshll.u32 %s156_s8, 4  ;;  %s836_s9 = int_to_ptr.vmem [resolvable:$true] %s165_s9 }
  0x13   : > { %s519_s7 = sshll.u32 %s162_s6, 7  ;;  %p842_p10 = pnand %p539_p8, %p812_p5 }
  0x14   : > { %s834_s12 = scalar_lea.hbm %s949_s0, %s519_s7  ;;  %s847_s23 = scalar_lea.sflag [#allocation5], %s152_s29 }
  0x15   : > { %s636_s24 = scalar_lea.hbm %s834_s12, 512  ;;  %p638_p13 = pneg %p842_p10 }
  0x16   : > { %p637_p12 = scmp.ne.s32.totalorder %s834_s12, %s636_s24  ;;  %s641_s28 = scalar_lea.hbm %s949_s0, 3072 }
  0x17   : > { %p642_p2 = scmp.lt.u32.totalorder %s834_s12, %s949_s0  ;;  %p643_p3 = scmp.lt.u32.totalorder %s641_s28, %s636_s24 }
  0x18   : > { %p639_p0 = pnand %p638_p13, %p637_p12  ;;  %p645_p5 = scmp.lt.u32.totalorder %s636_s24, %s834_s12 }
  0x19   : > { %p644_p4 = por %p643_p3, %p642_p2 }
  0x1a   : > { %p640_p1 = pneg %p639_p0 }
  0x1b   : > { %p646_p6 = por %p645_p5, %p644_p4 }
  0x1d   : > { %p647_p8 = pnand %p646_p6, %p640_p1 }
  0x1f   : > { %650 = shalt.err (!%p647_p8)
}
  0x20   : > { %s651_s29 = scalar_lea.vmem %s836_s9, 512  ;;  %s734_s6 = smov [#allocation4]  }
  0x21   : > { %p652_p9 = scmp.ne.s32.totalorder %s836_s9, %s651_s29  ;;  %s656_s7 = sshll.u32 %s734_s6, 4  ;;  %s657_s7 = int_to_ptr.vmem [resolvable:$false] %s656_s7 }
  0x22   : > { %s658_s8 = scalar_lea.vmem %s657_s7, 1024  ;;  %p659_p11 = scmp.lt.s32.totalorder %s836_s9, %s657_s7 }
  0x23   : > { %p654_p12 = pnand %p652_p9, %p638_p13  ;;  %p660_p2 = scmp.lt.s32.totalorder %s658_s8, %s651_s29 }
  0x25   : > { %p655_p0 = pneg %p654_p12  ;;  %p661_p3 = por %p660_p2, %p659_p11 }
  0x27   : > { %p662_p4 = pnand %p661_p3, %p655_p0 }
  0x29   : > { %665 = shalt.err (!%p662_p4)
}
  0x2a   : > { %s735_s10 = smov 384   ;;  %s736_s11 = smov 128  }
  0x2b   : > { %s737_s24 = smov 8   ;;  %p191_p13 = scmp.lt.s32.totalorder %s732_s19, 7 }
  0x2c   : > { %538 = dma.hbm_to_vmem [thread:$0]  (!%p842_p10), %s834_s12, 512, %s836_s9, %s847_s23, %s735_s10, %s736_s11, %s737_s24  }
  0x2d   : > { %p956_p1 = scmp.ge.s32.totalorder %s732_s19, 1 }
  0x2f   : > { %p192_p5 = pnand %p956_p1, %p191_p13 }
  0x30   : > { %s197_s27 = sand.u32 (!%p192_p5), 1, %s708_s13  }
  0x31   : > { %195 = sbr.rel (%p192_p5) target bundleno = 537 (0x219), region = 32  ;;  %s521_s25 = sshll.u32 (!%p192_p5), %s197_s27, 5 }
  0x32   : > { %s198_s28 = scalar_lea.sflag (!%p192_p5), [#allocation5], %s197_s27  ;;  %s201_s30 = scalar_lea.vmem (!%p192_p5), [#allocation4], %s521_s25 }
  0x38   : > { %699 = dma.done.wait (%p818_p7), %s198_s28, 512  }
  0x39   : > { %701 = vsyncadd (%p818_p7), %s198_s28, 4294966784  ;;  %s522_s4 = sshll.u32 %s720_s16, 2  ;;  %p528_p7 = scmp.ne.s32.totalorder %s716_s15, 0 }
  0x3a   : > { %p236_p11 = scmp.lt.s32.totalorder %s522_s4, 7  ;;  %vm257_vm0 = vcmask (!%p528_p7), 7168   ;;  %v738_v0 = vmov (!%p528_p7), -3.4028235e+38   ;;  %v739_v1 = vmov (!%p528_p7), 0.0  }
  0x3b   : > { %256 = sbr.rel (%p528_p7) target bundleno = 66 (0x42), region = 40  ;;  %258 = vst.msk [vmem:[#allocation2] sm:$0xff] (!%p528_p7), %vm257_vm0, %v738_v0  ;;  %259 = vst.msk [vmem:[#allocation2 + $0x8] sm:$0xff] (!%p528_p7), %vm257_vm0, %v738_v0 }
  0x3c   : > { %s971_s4 = smov (!%p236_p11, %s522_s4), 7  ;;  %260 = vst.msk [vmem:[#allocation2 + $0x10] sm:$0xff] (!%p528_p7), %vm257_vm0, %v738_v0  ;;  %261 = vst.msk [vmem:[#allocation2 + $0x18] sm:$0xff] (!%p528_p7), %vm257_vm0, %v738_v0 }
  0x3d   : > { %s523_s9 = sshll.u32 %s971_s4, 3  ;;  %262 = vst.msk [vmem:[#allocation3] sm:$0xff] (!%p528_p7), %vm257_vm0, %v739_v1  ;;  %263 = vst.msk [vmem:[#allocation3 + $0x8] sm:$0xff] (!%p528_p7), %vm257_vm0, %v739_v1 }
  0x3e   : > { %s887_s23 = scalar_lea.vmem %s950_s1, %s523_s9  ;;  %s892_s7 = scalar_lea.vmem %s951_s2, %s523_s9  ;;  %264 = vst.msk [vmem:[#allocation3 + $0x10] sm:$0xff] (!%p528_p7), %vm257_vm0, %v739_v1  ;;  %265 = vst.msk [vmem:[#allocation3 + $0x18] sm:$0xff] (!%p528_p7), %vm257_vm0, %v739_v1 }
  0x3f   : > { %s897_s26 = scalar_lea.vmem %s952_s3, %s523_s9 }
  0x42 PF: > { %v266_v2 = vld [vmem:[%s201_s30] sm:$0xff]  ;;  %v268_v3 = vld [vmem:[%s201_s30 + $0x10] sm:$0xff]  ;;  %v267_v4 = vld [vmem:[%s201_s30 + $0x8] sm:$0xff]  ;;  %v740_v6 = vmov 0   ;;  %vm350_vm1 = vcmask 7168   ;;  %p529_p10 = scmp.ne.s32.totalorder %s716_s15, 2 }
  0x43   : > { %274 = vmax.xlane.f32.xlu0 %v266_v2  ;;  %278 = vmax.xlane.f32.xlu1 %v268_v3  ;;  %v269_v5 = vld [vmem:[%s201_s30 + $0x18] sm:$0xff]  ;;  %v270_v7 = vld [vmem:[#allocation2] sm:$0xff]  ;;  %v272_v8 = vld [vmem:[#allocation2 + $0x10] sm:$0xff] }
  0x44   : > { %610 = vset.pattern.permute.xlu0 %v740_v6  ;;  %611 = vset.pattern.permute.xlu1 %v740_v6  ;;  %v271_v13 = vld [vmem:[#allocation2 + $0x8] sm:$0xff]  ;;  %v273_v14 = vld [vmem:[#allocation2 + $0x18] sm:$0xff]  ;;  %v330_v44 = vld [vmem:[#allocation3] sm:$0xff] }
  0x45   : > { %v331_v48 = vld [vmem:[#allocation3 + $0x8] sm:$0xff]  ;;  %v332_v53 = vld [vmem:[#allocation3 + $0x10] sm:$0xff]  ;;  %v333_v58 = vld [vmem:[#allocation3 + $0x18] sm:$0xff] }
  0x47   : > { %276 = vmax.xlane.f32.xlu0 %v267_v4  ;;  %280 = vmax.xlane.f32.xlu1 %v269_v5 }
  0xd0   : > { %v275_v9 = vpop.xlane.xlu0 %274  ;;  %v279_v10 = vpop.xlane.xlu1 %278 }
  0xd1   : > { %v282_v11 = vmax.f32 %v270_v7, %v275_v9  ;;  %v284_v12 = vmax.f32 %v272_v8, %v279_v10  ;;  %v383_v9 = vld [vmem:[%s887_s23] sm:$0xff] (!%p529_p10) }
  0xd3   : > { %v286_v15 = vsub.f32 %v270_v7, %v282_v11  ;;  %355 = vst.msk [vmem:[#allocation2] sm:$0xff] %vm350_vm1, %v282_v11  ;;  %300 = vperm.xlu0 %610, %v282_v11   ;;  %v288_v16 = vsub.f32 %v272_v8, %v284_v12  ;;  %357 = vst.msk [vmem:[#allocation2 + $0x10] sm:$0xff] %vm350_vm1, %v284_v12  ;;  %v391_v7 = vld [vmem:[%s892_s7] sm:$0xff] (!%p529_p10)  ;;  %v392_v11 = vld [vmem:[%s892_s7 + $0x8] sm:$0xff] (!%p529_p10) }
  0xd4   : > { %v277_v17 = vpop.xlane.xlu0 %276  ;;  %v281_v18 = vpop.xlane.xlu1 %280  ;;  %vm395_vm2 = vcmp.eq.s32.totalorder (!%p529_p10), %v391_v7, 0  ;;  %vm396_vm3 = vcmp.eq.s32.totalorder (!%p529_p10), %v392_v11, 0 }
  0xd5   : > { %v283_v19 = vmax.f32 %v271_v13, %v277_v17  ;;  %v285_v20 = vmax.f32 %v273_v14, %v281_v18  ;;  %v290_v39 = vmul.f32 1.442695, %v286_v15  ;;  %v294_v41 = vmul.f32 1.442695, %v288_v16 }
  0xd7   : > { %v287_v21 = vsub.f32 %v271_v13, %v283_v19  ;;  %356 = vst.msk [vmem:[#allocation2 + $0x8] sm:$0xff] %vm350_vm1, %v283_v19  ;;  %305 = vperm.xlu1 %611, %v283_v19   ;;  %v289_v22 = vsub.f32 %v273_v14, %v285_v20  ;;  %358 = vst.msk [vmem:[#allocation2 + $0x18] sm:$0xff] %vm350_vm1, %v285_v20  ;;  %v384_v14 = vld [vmem:[%s887_s23 + $0x8] sm:$0xff] (!%p529_p10)  ;;  %v393_v19 = vld [vmem:[%s892_s7 + $0x10] sm:$0xff] (!%p529_p10) }
  0xd8   : > { %vm397_vm4 = vcmp.eq.s32.totalorder (!%p529_p10), %v393_v19, 0 }
  0xd9   : > { %v292_v40 = vmul.f32 1.442695, %v287_v21  ;;  %v296_v42 = vmul.f32 1.442695, %v289_v22  ;;  %v385_v22 = vld [vmem:[%s887_s23 + $0x10] sm:$0xff] (!%p529_p10) }
  0xda   : > { %v365_v15 = vld [vmem:[#allocation2 + $0x10] sm:$0xff] (!%p529_p10) }
  0xdb   : > { %310 = vperm.xlu1 %611, %v284_v12  }
  0xde   : > { %v364_v8 = vld [vmem:[#allocation2 + $0x8] sm:$0xff] (!%p529_p10) }
  0xdf   : > { %315 = vperm.xlu1 %611, %v285_v20   ;;  %v366_v20 = vld [vmem:[#allocation2 + $0x18] sm:$0xff] (!%p529_p10) }
 0x152   : > { %v301_v23 = vpop.permute.xlu0 %300 }
 0x153   : > { %v318_v24 = vsub.f32 %v266_v2, %v301_v23 }
 0x155   : > { %v322_v25 = vmul.f32 1.442695, %v318_v24  ;;  %v394_v24 = vld [vmem:[%s892_s7 + $0x18] sm:$0xff] (!%p529_p10) }
 0x156   : > { %v306_v26 = vpop.permute.xlu1 %305  ;;  %vm398_vm5 = vcmp.eq.s32.totalorder (!%p529_p10), %v394_v24, 0 }
 0x157   : > { %612 = vpow2.f32 %v322_v25  ;;  %v319_v27 = vsub.f32 %v267_v4, %v306_v26  ;;  %v363_v4 = vld [vmem:[#allocation2] sm:$0xff] (!%p529_p10) }
 0x159   : > { %v324_v28 = vmul.f32 1.442695, %v319_v27  ;;  %v386_v27 = vld [vmem:[%s887_s23 + $0x18] sm:$0xff] (!%p529_p10) }
 0x15a   : > { %v311_v29 = vpop.permute.xlu1 %310 }
 0x15b   : > { %614 = vpow2.f32 %v324_v28  ;;  %v320_v30 = vsub.f32 %v268_v3, %v311_v29 }
 0x15d   : > { %v326_v31 = vmul.f32 1.442695, %v320_v30 }
 0x15e   : > { %v316_v32 = vpop.permute.xlu1 %315 }
 0x15f   : > { %616 = vpow2.f32 %v326_v31  ;;  %v321_v33 = vsub.f32 %v269_v5, %v316_v32 }
 0x161   : > { %v613_v34 = vpop.eup %612  ;;  %v328_v35 = vmul.f32 1.442695, %v321_v33 }
 0x162   : > { %338 = vadd.xlane.f32.xlu1 %v613_v34 }
 0x163   : > { %618 = vpow2.f32 %v328_v35 }
 0x164   : > { %620 = vpow2.f32 %v290_v39 }
 0x165   : > { %v615_v36 = vpop.eup %614  ;;  %622 = vpow2.f32 %v292_v40 }
 0x166   : > { %340 = vadd.xlane.f32.xlu0 %v615_v36  ;;  %624 = vpow2.f32 %v294_v41 }
 0x167   : > { %626 = vpow2.f32 %v296_v42 }
 0x169   : > { %v617_v37 = vpop.eup %616 }
 0x16a   : > { %342 = vadd.xlane.f32.xlu1 %v617_v37 }
 0x16d   : > { %v619_v38 = vpop.eup %618 }
 0x16e   : > { %344 = vadd.xlane.f32.xlu1 %v619_v38  ;;  %v621_v43 = vpop.eup %620 }
 0x16f   : > { %v334_v45 = vmul.f32 %v621_v43, %v330_v44  ;;  %v623_v46 = vpop.eup %622 }
 0x170   : > { %v335_v50 = vmul.f32 %v623_v46, %v331_v48  ;;  %v625_v51 = vpop.eup %624 }
 0x171   : > { %v336_v55 = vmul.f32 %v625_v51, %v332_v53  ;;  %v627_v56 = vpop.eup %626 }
 0x172   : > { %v337_v60 = vmul.f32 %v627_v56, %v333_v58 }
 0x1ef   : > { %v339_v47 = vpop.xlane.xlu1 %338 }
 0x1f0   : > { %v346_v49 = vadd.f32 %v339_v47, %v334_v45 }
 0x1f2   : > { %351 = vst.msk [vmem:[#allocation3] sm:$0xff] %vm350_vm1, %v346_v49 }
 0x1f3   : > { %v341_v52 = vpop.xlane.xlu0 %340 }
 0x1f4   : > { %v347_v54 = vadd.f32 %v341_v52, %v335_v50 }
 0x1f6   : > { %352 = vst.msk [vmem:[#allocation3 + $0x8] sm:$0xff] %vm350_vm1, %v347_v54 }
 0x1f7   : > { %v343_v57 = vpop.xlane.xlu1 %342 }
 0x1f8   : > { %v348_v59 = vadd.f32 %v343_v57, %v336_v55  ;;  %362 = sbr.rel (%p529_p10) target bundleno = 537 (0x219), region = 44 }
 0x1f9   : > { %v367_v63 = vld [vmem:[#allocation3] sm:$0xff] (!%p529_p10) }
 0x1fa   : > { %353 = vst.msk [vmem:[#allocation3 + $0x10] sm:$0xff] %vm350_vm1, %v348_v59  ;;  %628 = vlog2.f32 (!%p529_p10), %v367_v63 }
 0x1fb   : > { %v345_v61 = vpop.xlane.xlu1 %344 }
 0x1fc   : > { %v349_v62 = vadd.f32 %v345_v61, %v337_v60 }
 0x1fd   : > { %v368_v0 = vld [vmem:[#allocation3 + $0x8] sm:$0xff] (!%p529_p10) }
 0x1fe   : > { %354 = vst.msk [vmem:[#allocation3 + $0x18] sm:$0xff] %vm350_vm1, %v349_v62  ;;  %630 = vlog2.f32 (!%p529_p10), %v368_v0 }
 0x201   : > { %v369_v1 = vld [vmem:[#allocation3 + $0x10] sm:$0xff] }
 0x202   : > { %632 = vlog2.f32 %v369_v1 }
 0x204   : > { %v629_v3 = vpop.eup %628 }
 0x205   : > { %v370_v2 = vld [vmem:[#allocation3 + $0x18] sm:$0xff]  ;;  %v372_v6 = vmul.f32 0.6931472, %v629_v3 }
 0x206   : > { %634 = vlog2.f32 %v370_v2 }
 0x207   : > { %v379_v13 = vadd.f32 %v372_v6, %v363_v4 }
 0x208   : > { %v631_v5 = vpop.eup %630 }
 0x209   : > { %v374_v10 = vmul.f32 0.6931472, %v631_v5  ;;  %v387_v21 = vsub.f32 %v379_v13, %v383_v9 }
 0x20b   : > { %v380_v17 = vadd.f32 %v374_v10, %v364_v8  ;;  %v399_v28 = vsel %vm395_vm2, 0.0, %v387_v21 }
 0x20c   : > { %v633_v12 = vpop.eup %632  ;;  %403 = vst.msk [vmem:[%s897_s26] sm:$0xff] %vm350_vm1, %v399_v28 }
 0x20d   : > { %v376_v18 = vmul.f32 0.6931472, %v633_v12  ;;  %v388_v25 = vsub.f32 %v380_v17, %v384_v14 }
 0x20f   : > { %v381_v26 = vadd.f32 %v376_v18, %v365_v15  ;;  %v400_v30 = vsel %vm396_vm3, 0.0, %v388_v25 }
 0x210   : > { %v635_v16 = vpop.eup %634  ;;  %404 = vst.msk [vmem:[%s897_s26 + $0x8] sm:$0xff] %vm350_vm1, %v400_v30 }
 0x211   : > { %v378_v23 = vmul.f32 0.6931472, %v635_v16  ;;  %v389_v31 = vsub.f32 %v381_v26, %v385_v22 }
 0x213   : > { %v382_v29 = vadd.f32 %v378_v23, %v366_v20  ;;  %v401_v33 = vsel %vm397_vm4, 0.0, %v389_v31 }
 0x214   : > { %405 = vst.msk [vmem:[%s897_s26 + $0x10] sm:$0xff] %vm350_vm1, %v401_v33 }
 0x215   : > { %v390_v32 = vsub.f32 %v382_v29, %v386_v27 }
 0x217   : > { %v402_v34 = vsel %vm398_vm5, 0.0, %v390_v32 }
 0x218   : > { %406 = vst.msk [vmem:[%s897_s26 + $0x18] sm:$0xff] %vm350_vm1, %v402_v34 }
 0x219 PF: > { %s16_s19 = sadd.s32 1, %s732_s19   ;;  %s957_s12 = smov %s708_s13 }
 0x21a   : > { %p13_p6 = scmp.ge.s32.totalorder %s16_s19, 8   ;;  %s958_s13 = smov %s712_s14 }
 0x21b   : > { %s959_s14 = smov %s828_s5  ;;  %s960_s15 = smov %s724_s17 }
 0x21c   : > { %s961_s16 = smov %s728_s18  ;;  %s962_s17 = smov %s965_s21 }
 0x21d   : > { %s963_s18 = smov %s969_s22  ;;  %15 = sbr.rel (!%p13_p6) target bundleno = 5 (0x5), region = 86 }
 0x224   :  { %429 = vsyncpa [#allocation5], 1 }
 0x225   :  { %431 = vsyncpa [#allocation5 + $0x1], 1 }

</bundles_post_ra>
